<compile_context>
chip_gen: v6e
topology: v6e:2x2x1
jax: 0.10.0
libtpu: 0.0.40
codegen_flags: <defaults>
</compile_context>

<pallas_src>
import jax
import jax.numpy as jnp
from jax.experimental import pallas as pl
from jax.experimental.pallas import tpu as pltpu

_LANES = 128
_MAX_INFLIGHT_DMAS = 8                    # review: 4-8 in-flight HBM->HBM copies
_TARGET_CHUNK_BYTES = 4 * 1024 * 1024     # aim for ~4 MiB per DMA on large inputs


def _choose_cols(total):
    """Widest lane dimension (multiple of 128) that divides the element count."""
    for cols in (4096, 2048, 1024, 512, 256, _LANES):
        if total % cols == 0:
            return cols
    return None


def _choose_n_chunks(rows, cols, itemsize):
    """4-8 in-flight DMAs for large copies, fewer for small ones (all static)."""
    nbytes = rows * cols * itemsize
    by_bytes = -(-nbytes // _TARGET_CHUNK_BYTES)   # ceil division
    return max(1, min(_MAX_INFLIGHT_DMAS, rows, by_bytes))


def _make_dma_copy_kernel(rows, n_chunks):
    """Kernel: chunked HBM->HBM copy, start all DMAs then wait on all of them."""
    base = rows // n_chunks
    bounds = []
    for c in range(n_chunks):
        start = c * base
        size = base if c < n_chunks - 1 else rows - start   # tail absorbs remainder
        bounds.append((start, size))

    def kernel(x_hbm, o_hbm, sems):
        copies = [
            pltpu.make_async_copy(
                x_hbm.at[pl.ds(start, size), :],
                o_hbm.at[pl.ds(start, size), :],
                sems.at[c],
            )
            for c, (start, size) in enumerate(bounds)
        ]
        for cp in copies:      # issue all DMAs (in flight concurrently)
            cp.start()
        for cp in copies:      # then drain them
            cp.wait()

    return kernel


def _hbm_dma_copy_2d(flat2d):
    """Direct HBM->HBM DMA copy of a lane-dense (rows, cols) slab, no VMEM staging."""
    rows, cols = flat2d.shape
    nbytes = rows * cols * flat2d.dtype.itemsize
    n_chunks = _choose_n_chunks(rows, cols, flat2d.dtype.itemsize)

    return pl.pallas_call(
        _make_dma_copy_kernel(rows, n_chunks),
        out_shape=jax.ShapeDtypeStruct((rows, cols), flat2d.dtype),
        in_specs=[pl.BlockSpec(memory_space=pl.ANY)],
        out_specs=pl.BlockSpec(memory_space=pl.ANY),
        scratch_shapes=[pltpu.SemaphoreType.DMA((n_chunks,))],
        cost_estimate=pl.CostEstimate(
            flops=0, transcendentals=0, bytes_accessed=2 * nbytes
        ),
    )(flat2d)


class YoloReshape:
    """JAX/Pallas equivalent of the PyTorch YoloReshape module.

    Default path is the metadata-only jnp.reshape (reshape is free in XLA; any
    kernel can only add a redundant 2*nbytes HBM round trip).  Set
    `force_copy=True` to materialize the result via the Pallas HBM->HBM DMA
    copy kernel (used by the self-test below).
    """

    def __init__(self, *target_shape, force_copy=False):
        self.target_shape = tuple(target_shape)
        self.force_copy = force_copy

    def __call__(self, x):
        if not self.force_copy:
            return jnp.reshape(x, self.target_shape)

        total = x.size
        cols = _choose_cols(total)
        if cols is None:
            # Element count not a multiple of 128: no lane-dense slab exists,
            # and the metadata-only reshape is both correct and fastest.
            return jnp.reshape(x, self.target_shape)

        # Row-major flatten (same contiguous semantics as torch.reshape) to a
        # wide lane-dense slab; these reshapes are metadata-only around the
        # single HBM read + HBM write performed by the chunked DMA copy.
        rows = total // cols
        flat2d = jnp.reshape(x, (rows, cols))
        copied = _hbm_dma_copy_2d(flat2d)
        return jnp.reshape(copied, self.target_shape)


if __name__ == "__main__":
    key = jax.random.PRNGKey(0)
    # Small NCHW-style input, consistent with a conv feature map.
    x = jax.random.normal(key, (2, 4, 16, 16), dtype=jnp.float32)

    # Force the Pallas path so the DMA-copy kernel is compiled and run.
    module = YoloReshape(2, 16, 16, 4, force_copy=True)
    y = module(x)
    y = jax.block_until_ready(y)

    # Correctness check against plain JAX reshape (== torch.reshape semantics).
    y_ref = jnp.reshape(x, (2, 16, 16, 4))
    assert y.shape == (2, 16, 16, 4)
    assert y.dtype == x.dtype
    assert bool(jnp.array_equal(y, y_ref))

    # Default (metadata-only fast-path) module must agree as well.
    y_fast = jax.block_until_ready(YoloReshape(2, 16, 16, 4)(x))
    assert bool(jnp.array_equal(y_fast, y_ref))

    print("KERNEL_OK")
</pallas_src>

<mosaic_0001>
module attributes {stable_mosaic.version = 11 : i64} {
  func.func @kernel(%arg0: memref<1x2048xf32, #tpu.memory_space<any>>, %arg1: memref<1x2048xf32, #tpu.memory_space<any>>, %arg2: memref<1x!tpu.dma_semaphore, #tpu.memory_space<semaphore_mem>>) attributes {dimension_semantics = [], scalar_prefetch = 0 : i64, scratch_operands = 1 : i64, tpu.core_type = #tpu.core_type<tc>} {
    %c0_i32 = arith.constant 0 : i32
    %c0_i32_0 = arith.constant 0 : i32
    %c0_i32_1 = arith.constant 0 : i32
    %0 = tpu.memref_slice %arg0[%c0_i32_0, %c0_i32_1] : memref<1x2048xf32, #tpu.memory_space<any>> -> memref<1x2048xf32, #tpu.memory_space<any>>
    %c0_i32_2 = arith.constant 0 : i32
    %c0_i32_3 = arith.constant 0 : i32
    %1 = tpu.memref_slice %arg1[%c0_i32_2, %c0_i32_3] : memref<1x2048xf32, #tpu.memory_space<any>> -> memref<1x2048xf32, #tpu.memory_space<any>>
    %2 = tpu.memref_slice %arg2[%c0_i32] : memref<1x!tpu.dma_semaphore, #tpu.memory_space<semaphore_mem>> -> memref<1x!tpu.dma_semaphore, #tpu.memory_space<semaphore_mem>>
    %3 = tpu.memref_squeeze %2 : memref<1x!tpu.dma_semaphore, #tpu.memory_space<semaphore_mem>> -> memref<!tpu.dma_semaphore, #tpu.memory_space<semaphore_mem>>
    tpu.enqueue_dma source(%0 : memref<1x2048xf32, #tpu.memory_space<any>>) target(%1 : memref<1x2048xf32, #tpu.memory_space<any>>) target_semaphore(%3 : memref<!tpu.dma_semaphore, #tpu.memory_space<semaphore_mem>>)
    %c0_i32_4 = arith.constant 0 : i32
    %c0_i32_5 = arith.constant 0 : i32
    %c0_i32_6 = arith.constant 0 : i32
    %4 = tpu.memref_slice %arg0[%c0_i32_5, %c0_i32_6] : memref<1x2048xf32, #tpu.memory_space<any>> -> memref<1x2048xf32, #tpu.memory_space<any>>
    %c0_i32_7 = arith.constant 0 : i32
    %c0_i32_8 = arith.constant 0 : i32
    %5 = tpu.memref_slice %arg1[%c0_i32_7, %c0_i32_8] : memref<1x2048xf32, #tpu.memory_space<any>> -> memref<1x2048xf32, #tpu.memory_space<any>>
    %6 = tpu.memref_slice %arg2[%c0_i32_4] : memref<1x!tpu.dma_semaphore, #tpu.memory_space<semaphore_mem>> -> memref<1x!tpu.dma_semaphore, #tpu.memory_space<semaphore_mem>>
    %7 = tpu.memref_squeeze %6 : memref<1x!tpu.dma_semaphore, #tpu.memory_space<semaphore_mem>> -> memref<!tpu.dma_semaphore, #tpu.memory_space<semaphore_mem>>
    tpu.wait_dma2 semaphore(%7 : memref<!tpu.dma_semaphore, #tpu.memory_space<semaphore_mem>>) src(%4 : memref<1x2048xf32, #tpu.memory_space<any>>) dst(%5 : memref<1x2048xf32, #tpu.memory_space<any>>)
    return
  }
}

</mosaic_0001>

<bundles_post_ra>
// kernel: tpu_custom_call.1
= control target key start
LH: loop header
LB: loop body
LE: loop exit
PB: predicated region body
PF: predicated region fallthrough
CT: control target
= control target key end

     0   :  { %s28_s6 = smov [#allocation2]   ;;  %s29_s7 = smov 131072   ;;  %s47_s0 = inlined_call_operand.hbm [shape: f32[1,2048], index: 0, kind: input, shape index: {}]   ;;  %s48_s1 = inlined_call_operand.hbm [shape: f32[1,2048], index: 1, kind: output, shape index: {}]  }
   0x1   :  { %s30_s8 = smov 0  }
   0x2   :  { %12 = dma.general %s47_s0, 256, %s48_s1, %s28_s6, %s29_s7, [#allocation4], %s30_s8, 0  }
   0x3   :  { %26 = dma.done.wait [#allocation2], 256 }
   0x4   :  { %27 = vsyncadd [#allocation2], 4294967040 }
   0x5   :  { %16 = vsyncmov [#allocation2] }
   0x8   :  { %s17_s13 = vpop.sfrf %16 }
   0x9   :  { %p22_p0 = scmp.ne.s32.totalorder %s17_s13, 0 }
   0xb   :  { %21 = shalt.err (%p22_p0)  }

</bundles_post_ra>
